<compile_context>
chip_gen: v7x
topology: tpu7x:2x2x1
jax: 0.10.0
libtpu: 0.0.40
codegen_flags: <defaults>
</compile_context>

<pallas_src>
import functools

import jax
import jax.numpy as jnp
from jax import lax
from jax.experimental import pallas as pl
from jax.experimental.pallas import tpu as pltpu


# ---------------------------------------------------------------------------
# Generation-aware sizing
# ---------------------------------------------------------------------------
@functools.lru_cache(maxsize=None)
def _tpu_params():
    kind = ""
    try:
        kind = jax.devices()[0].device_kind.lower()
    except Exception:
        pass
    if "v7" in kind:          # 2 TensorCores/chip, 64 MiB VMEM, 256-wide MXU
        return {"cores": 2, "budget": 24 << 20, "mxu_k": 256, "vmem_limit": 48 << 20}
    if "v6" in kind:          # 1 TensorCore, 128 MiB VMEM, 256-wide MXU
        return {"cores": 1, "budget": 40 << 20, "mxu_k": 256, "vmem_limit": 96 << 20}
    if "v5e" in kind or "v5 lite" in kind or "v5litepod" in kind:
        return {"cores": 1, "budget": 40 << 20, "mxu_k": 128, "vmem_limit": 96 << 20}
    # Unknown generation: conservative budget, keep the default scoped limit.
    return {"cores": 2, "budget": 12 << 20, "mxu_k": 128, "vmem_limit": None}


def _largest_divisor_leq(n, cap):
    cap = max(1, min(int(cap), n))
    for d in range(cap, 0, -1):
        if n % d == 0:
            return d
    return 1


def _pick_supergroups(nks, r, hw, f, tk, c, itemsize, batch, params):
    """Largest super-group count per block whose footprint fits the VMEM budget."""
    # double-buffered pipeline blocks (native dtype), per super-group
    pipeline = 2 * itemsize * (r * c + f * c + r * tk * c)
    # f32/i32 in-kernel temporaries per super-group (pairwise compare dominates)
    temps = 4 * (2 * f * f + r * tk * f + r * tk * c + 8 * f) \
        + itemsize * (r * tk * f + 2 * f * c)
    per_sg = pipeline + temps
    # shared iotas / masks + slack
    fixed = 4 * (3 * f * f + 3 * r * tk * f) + (1 << 20)
    cap = max(1, (params["budget"] - fixed) // per_sg)
    # Keep >=2 grid steps only where a second TensorCore can use them (v7x).
    if batch == 1 and params["cores"] >= 2 and nks > 1:
        cap = min(cap, max(1, nks // 2))
    return _largest_divisor_leq(nks, cap)


# ---------------------------------------------------------------------------
# One-time probe: does Mosaic lower a (g, f, 1) -> (g, 1, f) minor transpose?
# ---------------------------------------------------------------------------
@functools.lru_cache(maxsize=None)
def _minor_transpose_supported(g, f):
    def probe(x_ref, o_ref):
        o_ref[...] = jnp.swapaxes(x_ref[...], -1, -2)

    try:
        x = jnp.arange(g * f, dtype=jnp.float32).reshape(g, f, 1)
        y = pl.pallas_call(
            probe, out_shape=jax.ShapeDtypeStruct((g, 1, f), jnp.float32))(x)
        y = jax.block_until_ready(y)
        return bool(jnp.all(y == jnp.swapaxes(x, -1, -2)))
    except Exception:
        return False


# ---------------------------------------------------------------------------
# Kernel
# ---------------------------------------------------------------------------
def _sampling_keep_token_kernel(tok_ref, feat_ref, out_ref, *, hw, tk, use_xpose):
    # tok_ref : (gg, r, c)        one query token per base group
    # feat_ref: (gg, r*hw, c)     r base groups folded along the sublane axis
    # out_ref : (gg, r*tk, c)     per-group top-k re-weighted features
    gg, f, c = feat_ref.shape
    r = f // hw
    scale = float(c) ** -0.5

    feat = feat_ref[...]                                   # native dtype (MXU rhs)
    tok = tok_ref[...]                                     # (gg, r, c)

    # --- attention logits per base group (4-D view; safe sublane-only reshape)
    # Product stays in the input dtype (bf16 VALU on v6e/v7x); accumulate in f32.
    feat4 = feat.reshape(gg, r, hw, c)
    tok4 = tok.reshape(gg, r, 1, c)
    logit4 = jnp.sum(tok4 * feat4, axis=-1, keepdims=True,
                     dtype=jnp.float32) * scale            # (gg, r, hw, 1)
    m4 = jnp.max(logit4, axis=-2, keepdims=True)           # per-group max
    e4 = jnp.exp(logit4 - m4)                              # unnormalized softmax
    e_col = e4.reshape(gg, f, 1)                           # (gg, f, 1)  folded

    # --- iotas / group masks (no vector int div, no lane-crossing reshapes) ---
    sub_i = lax.broadcasted_iota(jnp.int32, (f, f), 0)
    lane_i = lax.broadcasted_iota(jnp.int32, (f, f), 1)
    sub_g0 = lax.broadcasted_iota(jnp.int32, (r, hw, f), 0).reshape(f, f) * hw
    same_grp = (lane_i >= sub_g0) & (lane_i < sub_g0 + hw)  # block-diagonal mask

    # --- exact transpose e_col -> e_row (bit-identical source for tie-break) --
    if use_xpose:
        e_row = jnp.swapaxes(e_col, -1, -2)                # (gg, 1, f) XLU vxpose
    else:
        # Fallback: diagonal select + sublane sum (adds only zeros -> bit exact).
        e_row = jnp.sum(jnp.where(sub_i == lane_i, e_col, 0.0),
                        axis=-2, keepdims=True)            # (gg, 1, f)

    # --- parallel rank-based top-k, restricted to each base group ------------
    # rank[j] = #{j' in group(j): e[j'] > e[j]} + #{j' < j in group: e[j'] == e[j]}
    beats = same_grp & ((e_col > e_row) |
                        ((e_col == e_row) & (sub_i < lane_i)))
    rank = jnp.sum(beats.astype(jnp.int32), axis=-2, keepdims=True)   # (gg, 1, f)

    # --- block-diagonal selection-weight matrix for a single filled MXU push --
    # Row T = (group T//tk, slot t = T%tk); nonzero at column J of the same
    # group where rank[J] == t, with value e[J].
    t_mod = lax.broadcasted_iota(jnp.int32, (r, tk, f), 1).reshape(r * tk, f)
    tg0 = lax.broadcasted_iota(jnp.int32, (r, tk, f), 0).reshape(r * tk, f) * hw
    j_lane = lax.broadcasted_iota(jnp.int32, (r * tk, f), 1)
    hit = (j_lane >= tg0) & (j_lane < tg0 + hw) & (rank == t_mod)
    w = jnp.where(hit, e_row, 0.0)                         # (gg, r*tk, f)

    # Gather + weighting as one well-filled batched MXU matmul (K = r*hw).
    out = jnp.einsum("gtf,gfc->gtc", w.astype(feat.dtype), feat,
                     preferred_element_type=jnp.float32)   # (gg, r*tk, c)

    # Per-group renormalization 1 / sum(top-k e).  Each w row holds exactly one
    # nonzero (the selected e), so its lane-sum recovers it exactly; applied to
    # the (r*tk, c) output rather than the larger (r*tk, r*hw) w (r*hw >= c).
    sel_e = jnp.sum(w, axis=-1, keepdims=True)             # (gg, r*tk, 1)
    gsum = jnp.sum(sel_e.reshape(gg, r, tk, 1), axis=-2, keepdims=True)
    inv = pl.reciprocal(gsum, approx=False)                # exact (tolerance 1e-4)
    out4 = out.reshape(gg, r, tk, c) * inv
    out_ref[...] = out4.reshape(gg, r * tk, c).astype(out_ref.dtype)


# ---------------------------------------------------------------------------
# Wrapper
# ---------------------------------------------------------------------------
def sampling_keep_token(token, feature, sampling_rate=0.5):
    b1, n1, k1, c = token.shape
    b2, n2, k2, hw, c2 = feature.shape
    assert b1 == b2 and c == c2 and n1 * k1 == n2 * k2
    nk = n1 * k1
    tk = int(hw * sampling_rate)
    if tk <= 0:
        raise ValueError("sampling_rate * hw must select at least one token")

    params = _tpu_params()
    # Fold r base groups per super-group so the gather matmul K-dim ~ MXU width.
    r = _largest_divisor_leq(nk, max(1, params["mxu_k"] // hw))
    f = r * hw
    nks = nk // r

    # Pure-metadata reshapes (free in XLA): build the folded layout outside.
    tok = token.reshape(b1, nks, r, c)
    feat = feature.reshape(b1, nks, f, c)

    itemsize = jnp.dtype(token.dtype).itemsize
    gg = _pick_supergroups(nks, r, hw, f, tk, c, itemsize, b1, params)
    grid = (b1, nks // gg)

    use_xpose = _minor_transpose_supported(gg, f)

    kernel = functools.partial(_sampling_keep_token_kernel,
                               hw=hw, tk=tk, use_xpose=use_xpose)

    flops = (2 * b1 * nk * hw * c              # logits
             + 3 * b1 * nks * f * f            # rank compare
             + 2 * b1 * nks * (r * tk) * f * c)  # folded gather matmul
    bytes_accessed = itemsize * (tok.size + feat.size + b1 * nk * tk * c)

    out = pl.pallas_call(
        kernel,
        out_shape=jax.ShapeDtypeStruct((b1, nks, r * tk, c), token.dtype),
        grid=grid,
        in_specs=[
            pl.BlockSpec((None, gg, r, c), lambda i, j: (i, j, 0, 0)),
            pl.BlockSpec((None, gg, f, c), lambda i, j: (i, j, 0, 0)),
        ],
        out_specs=pl.BlockSpec((None, gg, r * tk, c), lambda i, j: (i, j, 0, 0)),
        compiler_params=pltpu.CompilerParams(
            dimension_semantics=("parallel", "parallel"),
            vmem_limit_bytes=params["vmem_limit"]),
        cost_estimate=pl.CostEstimate(
            flops=flops,
            transcendentals=b1 * nk * hw,
            bytes_accessed=bytes_accessed),
    )(tok, feat)

    return out.reshape(b1, n1, k1, tk, c)


# ---------------------------------------------------------------------------
# Pure-JAX reference mirroring the PyTorch forward
# ---------------------------------------------------------------------------
def sampling_keep_token_ref(token, feature, sampling_rate=0.5):
    b1, n1, k1, c = token.shape
    b2, n2, k2, hw, c2 = feature.shape
    nk = n1 * k1
    tk = int(hw * sampling_rate)
    tok = token.reshape(b1, nk, 1, c)
    feat = feature.reshape(b2, nk, hw, c)
    attn = jnp.einsum("bnqc,bnhc->bnqh", tok, feat) * (c ** -0.5)
    attn = jax.nn.softmax(attn, axis=-1)
    sel_attn, sel_idx = lax.top_k(attn, tk)
    sel_attn = sel_attn / jnp.sum(sel_attn, axis=-1, keepdims=True)
    sel_idx = sel_idx.reshape(b1, nk, tk)
    sel_feat = jnp.take_along_axis(feat, sel_idx[..., None], axis=2)
    out = sel_attn.reshape(b1, nk, tk, 1) * sel_feat
    return out.reshape(b1, n1, k1, tk, c)


if __name__ == "__main__":
    key = jax.random.PRNGKey(0)
    k1k, k2k, k3k, k4k = jax.random.split(key, 4)

    # Config 1: canonical small shapes.
    b, n1, k1, c = 2, 2, 2, 32
    n2, k2, hw = 2, 2, 16
    rate = 0.5
    token = jax.random.normal(k1k, (b, n1, k1, c), dtype=jnp.float32)
    feature = jax.random.normal(k2k, (b, n2, k2, hw, c), dtype=jnp.float32)
    run = jax.jit(functools.partial(sampling_keep_token, sampling_rate=rate))
    out = jax.block_until_ready(run(token, feature))
    ref = sampling_keep_token_ref(token, feature, rate)
    if not jnp.allclose(out, ref, rtol=1e-4, atol=1e-4):
        raise RuntimeError("Pallas kernel does not match reference (config 1)")

    # Config 2: batch==1 (core-count gating) + larger hw (bigger fold / F).
    b, n1, k1, c = 1, 2, 2, 32
    n2, k2, hw = 2, 2, 128
    rate = 0.25
    token = jax.random.normal(k3k, (b, n1, k1, c), dtype=jnp.float32)
    feature = jax.random.normal(k4k, (b, n2, k2, hw, c), dtype=jnp.float32)
    run = jax.jit(functools.partial(sampling_keep_token, sampling_rate=rate))
    out = jax.block_until_ready(run(token, feature))
    ref = sampling_keep_token_ref(token, feature, rate)
    if not jnp.allclose(out, ref, rtol=1e-4, atol=1e-4):
        raise RuntimeError("Pallas kernel does not match reference (config 2)")

    print("KERNEL_OK")
</pallas_src>

<mosaic_0001>
module attributes {stable_mosaic.version = 11 : i64} {
  func.func @_sampling_keep_token_kernel(%arg0: i32, %arg1: i32, %arg2: memref<1x1x4x32xf32, #tpu.memory_space<vmem>>, %arg3: memref<1x1x64x32xf32, #tpu.memory_space<vmem>>, %arg4: memref<1x1x32x32xf32, #tpu.memory_space<vmem>>) attributes {dimension_semantics = [#tpu.dimension_semantics<parallel>, #tpu.dimension_semantics<parallel>], iteration_bounds = array<i64: 2, 1>, scalar_prefetch = 0 : i64, scratch_operands = 0 : i64, tpu.core_type = #tpu.core_type<tc>, window_params = [{transform_indices = @transform_0, window_bounds = array<i64: 1, 1, 4, 32>}, {transform_indices = @transform_1, window_bounds = array<i64: 1, 1, 64, 32>}, {transform_indices = @transform_2, window_bounds = array<i64: 1, 1, 32, 32>}]} {
    %c0 = arith.constant 0 : index
    %c0_0 = arith.constant 0 : index
    %c0_1 = arith.constant 0 : index
    %c0_2 = arith.constant 0 : index
    %0 = vector.load %arg3[%c0, %c0_0, %c0_1, %c0_2] : memref<1x1x64x32xf32, #tpu.memory_space<vmem>>, vector<1x1x64x32xf32>
    %1 = vector.shape_cast %0 : vector<1x1x64x32xf32> to vector<1x64x32xf32>
    %c0_3 = arith.constant 0 : index
    %c0_4 = arith.constant 0 : index
    %c0_5 = arith.constant 0 : index
    %c0_6 = arith.constant 0 : index
    %2 = vector.load %arg2[%c0_3, %c0_4, %c0_5, %c0_6] : memref<1x1x4x32xf32, #tpu.memory_space<vmem>>, vector<1x1x4x32xf32>
    %3 = vector.shape_cast %2 : vector<1x1x4x32xf32> to vector<1x4x32xf32>
    %4 = vector.shape_cast %1 : vector<1x64x32xf32> to vector<1x4x16x32xf32>
    %5 = vector.shape_cast %3 : vector<1x4x32xf32> to vector<1x4x1x32xf32>
    %6 = vector.broadcast %5 : vector<1x4x1x32xf32> to vector<1x4x16x32xf32>
    %7 = arith.mulf %6, %4 : vector<1x4x16x32xf32>
    %cst = arith.constant dense<0.000000e+00> : vector<1x4x16xf32>
    %8 = vector.multi_reduction <add>, %7, %cst [3] : vector<1x4x16x32xf32> to vector<1x4x16xf32>
    %9 = vector.shape_cast %8 : vector<1x4x16xf32> to vector<1x4x16x1xf32>
    %cst_7 = arith.constant 0.176776692 : f32
    %10 = vector.broadcast %cst_7 : f32 to vector<1x4x16x1xf32>
    %11 = arith.mulf %9, %10 : vector<1x4x16x1xf32>
    %cst_8 = arith.constant dense<0xFF800000> : vector<1x4x1xf32>
    %12 = vector.multi_reduction <maximumf>, %11, %cst_8 [2] : vector<1x4x16x1xf32> to vector<1x4x1xf32>
    %13 = vector.shape_cast %12 : vector<1x4x1xf32> to vector<1x4x1x1xf32>
    %14 = vector.broadcast %13 : vector<1x4x1x1xf32> to vector<1x4x16x1xf32>
    %15 = arith.subf %11, %14 : vector<1x4x16x1xf32>
    %16 = math.exp %15 : vector<1x4x16x1xf32>
    %17 = vector.shape_cast %16 : vector<1x4x16x1xf32> to vector<1x64x1xf32>
    %18 = tpu.iota {dimensions = array<i32: 0>} : vector<64x64xi32>
    %19 = tpu.iota {dimensions = array<i32: 1>} : vector<64x64xi32>
    %20 = tpu.iota {dimensions = array<i32: 0>} : vector<4x16x64xi32>
    %21 = vector.shape_cast %20 : vector<4x16x64xi32> to vector<64x64xi32>
    %c16_i32 = arith.constant 16 : i32
    %22 = vector.broadcast %c16_i32 : i32 to vector<64x64xi32>
    %23 = arith.muli %21, %22 : vector<64x64xi32>
    %24 = arith.cmpi sge, %19, %23 : vector<64x64xi32>
    %c16_i32_9 = arith.constant 16 : i32
    %25 = vector.broadcast %c16_i32_9 : i32 to vector<64x64xi32>
    %26 = arith.addi %23, %25 : vector<64x64xi32>
    %27 = arith.cmpi slt, %19, %26 : vector<64x64xi32>
    %28 = arith.andi %24, %27 : vector<64x64xi1>
    %29 = arith.cmpi eq, %18, %19 : vector<64x64xi32>
    %cst_10 = arith.constant 0.000000e+00 : f32
    %30 = vector.shape_cast %29 : vector<64x64xi1> to vector<1x64x64xi1>
    %31 = vector.shape_cast %17 : vector<1x64x1xf32> to vector<1x64x1xf32>
    %32 = vector.broadcast %31 : vector<1x64x1xf32> to vector<1x64x64xf32>
    %33 = vector.broadcast %cst_10 : f32 to vector<1x64x64xf32>
    %34 = arith.select %30, %32, %33 : vector<1x64x64xi1>, vector<1x64x64xf32>
    %cst_11 = arith.constant dense<0.000000e+00> : vector<1x64xf32>
    %35 = vector.multi_reduction <add>, %34, %cst_11 [1] : vector<1x64x64xf32> to vector<1x64xf32>
    %36 = vector.shape_cast %35 : vector<1x64xf32> to vector<1x1x64xf32>
    %37 = vector.broadcast %17 : vector<1x64x1xf32> to vector<1x64x64xf32>
    %38 = vector.broadcast %36 : vector<1x1x64xf32> to vector<1x64x64xf32>
    %39 = arith.cmpf ogt, %37, %38 : vector<1x64x64xf32>
    %40 = vector.broadcast %17 : vector<1x64x1xf32> to vector<1x64x64xf32>
    %41 = vector.broadcast %36 : vector<1x1x64xf32> to vector<1x64x64xf32>
    %42 = arith.cmpf oeq, %40, %41 : vector<1x64x64xf32>
    %43 = arith.cmpi slt, %18, %19 : vector<64x64xi32>
    %44 = vector.shape_cast %43 : vector<64x64xi1> to vector<1x64x64xi1>
    %45 = arith.andi %42, %44 : vector<1x64x64xi1>
    %46 = arith.ori %39, %45 : vector<1x64x64xi1>
    %47 = vector.shape_cast %28 : vector<64x64xi1> to vector<1x64x64xi1>
    %48 = arith.andi %47, %46 : vector<1x64x64xi1>
    %49 = arith.extui %48 : vector<1x64x64xi1> to vector<1x64x64xi32>
    %cst_12 = arith.constant dense<0> : vector<1x64xi32>
    %50 = vector.multi_reduction <add>, %49, %cst_12 [1] : vector<1x64x64xi32> to vector<1x64xi32>
    %51 = vector.shape_cast %50 : vector<1x64xi32> to vector<1x1x64xi32>
    %52 = tpu.iota {dimensions = array<i32: 1>} : vector<4x8x64xi32>
    %53 = vector.shape_cast %52 : vector<4x8x64xi32> to vector<32x64xi32>
    %54 = tpu.iota {dimensions = array<i32: 0>} : vector<4x8x64xi32>
    %55 = vector.shape_cast %54 : vector<4x8x64xi32> to vector<32x64xi32>
    %c16_i32_13 = arith.constant 16 : i32
    %56 = vector.broadcast %c16_i32_13 : i32 to vector<32x64xi32>
    %57 = arith.muli %55, %56 : vector<32x64xi32>
    %58 = tpu.iota {dimensions = array<i32: 1>} : vector<32x64xi32>
    %59 = arith.cmpi sge, %58, %57 : vector<32x64xi32>
    %c16_i32_14 = arith.constant 16 : i32
    %60 = vector.broadcast %c16_i32_14 : i32 to vector<32x64xi32>
    %61 = arith.addi %57, %60 : vector<32x64xi32>
    %62 = arith.cmpi slt, %58, %61 : vector<32x64xi32>
    %63 = arith.andi %59, %62 : vector<32x64xi1>
    %64 = vector.shape_cast %53 : vector<32x64xi32> to vector<1x32x64xi32>
    %65 = vector.broadcast %51 : vector<1x1x64xi32> to vector<1x32x64xi32>
    %66 = arith.cmpi eq, %65, %64 : vector<1x32x64xi32>
    %67 = vector.shape_cast %63 : vector<32x64xi1> to vector<1x32x64xi1>
    %68 = arith.andi %67, %66 : vector<1x32x64xi1>
    %cst_15 = arith.constant 0.000000e+00 : f32
    %69 = vector.shape_cast %36 : vector<1x1x64xf32> to vector<1x1x64xf32>
    %70 = vector.broadcast %69 : vector<1x1x64xf32> to vector<1x32x64xf32>
    %71 = vector.broadcast %cst_15 : f32 to vector<1x32x64xf32>
    %72 = arith.select %68, %70, %71 : vector<1x32x64xi1>, vector<1x32x64xf32>
    "tpu.trace_start"() <{level = 10 : i32, message = "gtf,gfc->gtc"}> : () -> ()
    %cst_16 = arith.constant dense<0.000000e+00> : vector<1x32x32xf32>
    %73 = tpu.matmul %72, %1, %cst_16 {dimension_numbers = #tpu.dot_dimension_numbers<[2], [1], [1], [2], [0, 0, 0, 1, 1, 2], [0], [0]>} : vector<1x32x64xf32>, vector<1x64x32xf32>, vector<1x32x32xf32> -> vector<1x32x32xf32>
    "tpu.trace_stop"() : () -> ()
    %cst_17 = arith.constant dense<0.000000e+00> : vector<1x32xf32>
    %74 = vector.multi_reduction <add>, %72, %cst_17 [2] : vector<1x32x64xf32> to vector<1x32xf32>
    %75 = vector.shape_cast %74 : vector<1x32xf32> to vector<1x32x1xf32>
    %76 = vector.shape_cast %75 : vector<1x32x1xf32> to vector<1x4x8x1xf32>
    %cst_18 = arith.constant dense<0.000000e+00> : vector<1x4x1xf32>
    %77 = vector.multi_reduction <add>, %76, %cst_18 [2] : vector<1x4x8x1xf32> to vector<1x4x1xf32>
    %78 = vector.shape_cast %77 : vector<1x4x1xf32> to vector<1x4x1x1xf32>
    %79 = tpu.reciprocal %78 : vector<1x4x1x1xf32> -> vector<1x4x1x1xf32>
    %80 = vector.shape_cast %73 : vector<1x32x32xf32> to vector<1x4x8x32xf32>
    %81 = vector.broadcast %79 : vector<1x4x1x1xf32> to vector<1x4x8x32xf32>
    %82 = arith.mulf %80, %81 : vector<1x4x8x32xf32>
    %83 = vector.shape_cast %82 : vector<1x4x8x32xf32> to vector<1x32x32xf32>
    %c0_19 = arith.constant 0 : index
    %c0_20 = arith.constant 0 : index
    %c0_21 = arith.constant 0 : index
    %c0_22 = arith.constant 0 : index
    %84 = vector.load %arg4[%c0_19, %c0_20, %c0_21, %c0_22] : memref<1x1x32x32xf32, #tpu.memory_space<vmem>>, vector<1x1x32x32xf32>
    %85 = vector.shape_cast %84 : vector<1x1x32x32xf32> to vector<1x32x32xf32>
    %86 = vector.shape_cast %83 : vector<1x32x32xf32> to vector<1x1x32x32xf32>
    tpu.vector_store %arg4[%c0_19, %c0_20, %c0_21, %c0_22], %86 {strides = array<i32>} : memref<1x1x32x32xf32, #tpu.memory_space<vmem>>, vector<1x1x32x32xf32>,
    return
  }
  func.func @transform_0(%arg0: i32, %arg1: i32) -> (i32, i32, i32, i32) {
    %c0_i32 = arith.constant 0 : i32
    %c0_i32_0 = arith.constant 0 : i32
    %c0_i32_1 = arith.constant 0 : i32
    return %arg0, %arg1, %c0_i32, %c0_i32_0 : i32, i32, i32, i32
  }
  func.func @transform_1(%arg0: i32, %arg1: i32) -> (i32, i32, i32, i32) {
    %c0_i32 = arith.constant 0 : i32
    %c0_i32_0 = arith.constant 0 : i32
    %c0_i32_1 = arith.constant 0 : i32
    return %arg0, %arg1, %c0_i32, %c0_i32_0 : i32, i32, i32, i32
  }
  func.func @transform_2(%arg0: i32, %arg1: i32) -> (i32, i32, i32, i32) {
    %c0_i32 = arith.constant 0 : i32
    %c0_i32_0 = arith.constant 0 : i32
    %c0_i32_1 = arith.constant 0 : i32
    return %arg0, %arg1, %c0_i32, %c0_i32_0 : i32, i32, i32, i32
  }
}

</mosaic_0001>

<bundles_post_ra>
// kernel: sampling_keep_token.1
= control target key start
LH: loop header
LB: loop body
LE: loop exit
PB: predicated region body
PF: predicated region fallthrough
CT: control target
= control target key end

     0   :  { %7 = vsyncpa [#allocation3], 0  ;;  %s1659_s0 = inlined_call_operand.hbm [shape: f32[2,1,4,32], index: 0, kind: input, shape index: {}]   ;;  %s1660_s1 = inlined_call_operand.hbm [shape: f32[2,1,64,32], index: 1, kind: input, shape index: {}]   ;;  %s1661_s2 = inlined_call_operand.hbm [shape: f32[2,1,32,32], index: 2, kind: output, shape index: {}]  }
   0x1   :  { %9 = vsyncpa [#allocation3 + $0x1], 0 }
   0x2   :  { %10 = vsyncpa [#allocation6], 0 }
   0x3   :  { %12 = vsyncpa [#allocation6 + $0x1], 0 }
   0x4   :  { %13 = vsyncpa [#allocation4], 0 }
   0x5   :  { %15 = vsyncpa [#allocation4 + $0x1], 0  ;;  %s1138_s9 = smov 0   ;;  %s1140_s10 = smov 0  }
   0x6   :  { %s1142_s11 = smov 0   ;;  %s1144_s12 = smov 0  }
   0x7   :  { %s1146_s13 = smov 0   ;;  %s1148_s14 = smov 0  }
   0x8 LB: > { %s786_s15 = sadd.s32 4294967295, %s1112_s14   ;;  %s787_s16 = sadd.s32 4294967294, %s1112_s14   ;;  %s1112_s14 = sphi %s1148_s14, %s21_s14   ;;  %s1108_s13 = sphi %s1146_s13, %s1751_s13   ;;  %s1104_s12 = sphi %s1144_s12, %s1750_s12   ;;  %s1100_s11 = sphi %s1142_s11, %s1749_s11   ;;  %s1096_s10 = sphi %s1140_s10, %s1748_s10   ;;  %s1092_s9 = sphi %s1138_s9, %s1747_s9  }
   0x9   : > { %s33_s17 = sadd.s32 1, %s1108_s13  ;;  %s42_s18 = sadd.s32 1, %s1100_s11 }
   0xa   : > { %p35_p0 = scmp.ge.s32.totalorder %s33_s17, 2  ;;  %p49_p1 = scmp.ne.s32.totalorder %s1100_s11, %s1096_s10 }
   0xb   : > { %p50_p2 = scmp.eq.s32.totalorder %s1112_s14, 0  ;;  %p55_p3 = scmp.ne.s32.totalorder %s1096_s10, %s1092_s9 }
   0xc   : > { %s1753_s17 = smov (%p35_p0, %s33_s17), 0  ;;  %p56_p5 = scmp.eq.s32.totalorder %s786_s15, 0 }
   0xd   : > { %p1179_p4 = por %p50_p2, %p49_p1  ;;  %s37_s20 = ssub.s32 %s1108_s13, %s1753_s17 }
   0xe   : > { %p109_p6 = scmp.eq.s32.totalorder %s786_s15, 1  ;;  %p40_p7 = scmp.eq.s32.totalorder %s37_s20, 0 }
   0xf   : > { %p1185_p8 = por %p56_p5, %p55_p3  ;;  %p115_p10 = scmp.eq.s32.totalorder %s787_s16, 1 }
  0x10   : > { %p1189_p9 = por %p109_p6, %p49_p1  ;;  %p886_p13 = scmp.lt.s32.totalorder %s1112_s14, 2 }
  0x11   : > { %s1670_s21 = scalar_select %p1185_p8, 1, 0 }
  0x12   : > { %s1671_s22 = scalar_select %p1189_p9, 1, 0 }
  0x13   : > { %s1194_s23 = scalar_select %p40_p7, %s1100_s11, %s42_s18  }
  0x14   : > { %p1196_p11 = por %p115_p10, %p55_p3  ;;  %s1203_s25 = sand.u32 1, %s1100_s11  }
  0x15   : > { %s790_s26 = sshll.u32 %s1203_s25, 2  ;;  %s791_s27 = sshll.u32 %s1108_s13, 6 }
  0x16   : > { %s1672_s24 = scalar_select %p1196_p11, 1, 0 }
  0x17   : > { %s1210_s30 = scalar_lea.hbm %s1659_s0, %s791_s27  ;;  %s139_s3 = scalar_lea.vmem [#allocation2], %s790_s26 }
  0x18   : > { %s147_s4 = sshll.u32 %s139_s3, 4  ;;  %p1216_p0 = pnand %p886_p13, %p1179_p4  ;;  %s1212_s4 = int_to_ptr.vmem [resolvable:$true] %s147_s4 }
  0x19   : > { %s136_s6 = scalar_lea.sflag [#allocation3], %s1203_s25  ;;  %s966_s7 = scalar_lea.hbm %s1210_s30, 64 }
  0x1a   : > { %p967_p3 = scmp.ne.s32.totalorder %s1210_s30, %s966_s7  ;;  %p968_p5 = pneg %p1216_p0 }
  0x1b   : > { %s971_s16 = scalar_lea.hbm %s1659_s0, 128  ;;  %p972_p4 = scmp.lt.u32.totalorder %s1210_s30, %s1659_s0 }
  0x1c   : > { %p969_p6 = pnand %p968_p5, %p967_p3  ;;  %p973_p10 = scmp.lt.u32.totalorder %s971_s16, %s966_s7 }
  0x1d   : > { %p975_p12 = scmp.lt.u32.totalorder %s966_s7, %s1210_s30 }
  0x1e   : > { %p970_p7 = pneg %p969_p6  ;;  %p974_p13 = por %p973_p10, %p972_p4 }
  0x20   : > { %p976_p1 = por %p975_p12, %p974_p13 }
  0x22   : > { %p977_p2 = pnand %p976_p1, %p970_p7 }
  0x24   : > { %980 = shalt.err (!%p977_p2)
}
  0x25   : > { %s981_s20 = scalar_lea.vmem %s1212_s4, 64  ;;  %s1114_s26 = smov [#allocation2]  }
  0x26   : > { %p982_p3 = scmp.ne.s32.totalorder %s1212_s4, %s981_s20  ;;  %s986_s27 = sshll.u32 %s1114_s26, 4  ;;  %s987_s27 = int_to_ptr.vmem [resolvable:$false] %s986_s27 }
  0x27   : > { %s988_s28 = scalar_lea.vmem %s987_s27, 128  ;;  %p989_p9 = scmp.lt.s32.totalorder %s1212_s4, %s987_s27 }
  0x28   : > { %p984_p6 = pnand %p982_p3, %p968_p5  ;;  %p990_p4 = scmp.lt.s32.totalorder %s988_s28, %s981_s20 }
  0x2a   : > { %p985_p11 = pneg %p984_p6  ;;  %p991_p10 = por %p990_p4, %p989_p9 }
  0x2c   : > { %p992_p12 = pnand %p991_p10, %p985_p11 }
  0x2e   : > { %995 = shalt.err (!%p992_p12)
}
  0x2f   : > { %878 = dma.hbm_to_vmem [thread:$0]  (!%p1216_p0), %s1210_s30, 64, %s1212_s4, %s136_s6  }
  0x30   : > { %p1674_p1 = scmp.lt.s32.totalorder %s1112_s14, 3  ;;  %p1675_p2 = scmp.ge.s32.totalorder %s1112_s14, 1 }
  0x31   : > { %s792_s3 = sshll.u32 %s1203_s25, 6  ;;  %s809_s7 = sshll.u32 %s1108_s13, 10 }
  0x32   : > { %p1252_p7 = pnand %p1675_p2, %p1674_p1  ;;  %s1261_s16 = scalar_lea.hbm %s1660_s1, %s809_s7 }
  0x33   : > { %s158_s18 = scalar_lea.vmem [#allocation5], %s792_s3  ;;  %s155_s30 = scalar_lea.sflag [#allocation6], %s1203_s25 }
  0x34   : > { %s167_s19 = sshll.u32 %s158_s18, 4  ;;  %s996_s4 = scalar_lea.hbm %s1261_s16, 1024  ;;  %s1263_s19 = int_to_ptr.vmem [resolvable:$true] %s167_s19 }
  0x35   : > { %p997_p9 = scmp.ne.s32.totalorder %s1261_s16, %s996_s4  ;;  %s1001_s26 = scalar_lea.hbm %s1660_s1, 2048 }
  0x36   : > { %p1002_p3 = scmp.lt.u32.totalorder %s1261_s16, %s1660_s1  ;;  %p1003_p6 = scmp.lt.u32.totalorder %s1001_s26, %s996_s4 }
  0x37   : > { %p999_p11 = pnand %p997_p9, %p968_p5  ;;  %p1005_p10 = scmp.lt.u32.totalorder %s996_s4, %s1261_s16 }
  0x38   : > { %p1004_p4 = por %p1003_p6, %p1002_p3 }
  0x39   : > { %p1000_p13 = pneg %p999_p11 }
  0x3a   : > { %p1006_p12 = por %p1005_p10, %p1004_p4 }
  0x3c   : > { %p1007_p1 = pnand %p1006_p12, %p1000_p13 }
  0x3e   : > { %1010 = shalt.err (!%p1007_p1)
}
  0x3f   : > { %s1011_s3 = scalar_lea.vmem %s1263_s19, 1024  ;;  %s1115_s7 = smov [#allocation5]  }
  0x40   : > { %p1012_p2 = scmp.ne.s32.totalorder %s1263_s19, %s1011_s3  ;;  %s1016_s8 = sshll.u32 %s1115_s7, 4  ;;  %s1017_s8 = int_to_ptr.vmem [resolvable:$false] %s1016_s8 }
  0x41   : > { %s1018_s15 = scalar_lea.vmem %s1017_s8, 2048  ;;  %p1019_p8 = scmp.lt.s32.totalorder %s1263_s19, %s1017_s8 }
  0x42   : > { %p1014_p9 = pnand %p1012_p2, %p968_p5  ;;  %p1020_p3 = scmp.lt.s32.totalorder %s1018_s15, %s1011_s3 }
  0x44   : > { %p1015_p11 = pneg %p1014_p9  ;;  %p1021_p6 = por %p1020_p3, %p1019_p8 }
  0x46   : > { %p1022_p4 = pnand %p1021_p6, %p1015_p11 }
  0x48   : > { %1025 = shalt.err (!%p1022_p4)
}
  0x49   : > { %s1116_s18 = smov 128   ;;  %s1117_s4 = smov 8  }
  0x4a   : > { %881 = dma.hbm_to_vmem [thread:$0]  (!%p1216_p0), %s1261_s16, 1024, %s1263_s19, %s155_s30, %s1116_s18, %s1116_s18, %s1117_s4  }
  0x4b   : > { %179 = sbr.rel (%p1252_p7) target bundleno = 597 (0x255), region = 28  ;;  %s1294_s6 = sand.u32 (!%p1252_p7), 1, %s1096_s10  }
  0x4c   : > { %s796_s20 = sshll.u32 (!%p1252_p7), %s1294_s6, 2  ;;  %s182_s26 = scalar_lea.sflag (!%p1252_p7), [#allocation3], %s1294_s6 }
  0x4d   : > { %s185_s27 = scalar_lea.vmem (!%p1252_p7), [#allocation2], %s796_s20  ;;  %p1677_p8 = scmp.ne.s32.totalorder (!%p1252_p7), %s1670_s21, 0 }
  0x52   : > { %1079 = dma.done.wait (%p1677_p8), %s182_s26, 64  }
  0x53   : > { %1081 = vsyncadd (%p1677_p8), %s182_s26, 4294967232  ;;  %s797_s25 = sshll.u32 %s1294_s6, 6  ;;  %s191_s5 = scalar_lea.sflag [#allocation6], %s1294_s6 }
  0x54   : > { %s1304_s29 = scalar_lea.vmem [#allocation5], %s797_s25 }
  0x55   : > { %1083 = dma.done.wait (%p1677_p8), %s191_s5, 1024  }
  0x56   : > { %1085 = vsyncadd (%p1677_p8), %s191_s5, 4294966272  ;;  %v241_v0 = vlaneseq  ;;  %v1118_v1 = vmov 1966171168   ;;  %v220_v7 = vld [vmem:[%s1304_s29] sm:$0xff]  ;;  %v222_v10 = vld [vmem:[%s1304_s29 + $0x10] sm:$0xff]  ;;  %vm1664_vm0 = vcmask 261120  }
  0x57   : > { %v239_v2 = vunpack.c.l.s4 %v1118_v1  ;;  %v799_v8 = vld.sshfl [vmem:[%s185_s27] sm:$0x33 pattern:$0x75316420]  ;;  %v221_v12 = vld [vmem:[%s1304_s29 + $0x8] sm:$0xff]  ;;  %v224_v24 = vld [vmem:[%s1304_s29 + $0x20] sm:$0xff] }
  0x58   : > { %v1311_v3 = vshrl.u32 %v241_v0, 7  ;;  %v237_v11 = vcombine.high %v799_v8, %v799_v8  ;;  %v223_v13 = vld [vmem:[%s1304_s29 + $0x18] sm:$0xff]  ;;  %v845_v14 = vpack.c.bf16 %v221_v12, %v220_v7  ;;  %v225_v23 = vld [vmem:[%s1304_s29 + $0x28] sm:$0xff]  ;;  %v226_v35 = vld [vmem:[%s1304_s29 + $0x30] sm:$0xff]  ;;  %vm1665_vm3 = vcmask 523264   ;;  %s798_s21 = sshll.u32 %s1294_s6, 5 }
  0x59   : > { %v240_v4 = vunpack.c.0.s8 %v239_v2  ;;  %v849_v15 = vpack.c.bf16 %v223_v13, %v222_v10  ;;  %v853_v29 = vpack.c.bf16 %v225_v23, %v224_v24  ;;  %v227_v34 = vld [vmem:[%s1304_s29 + $0x38] sm:$0xff]  ;;  %s219_s16 = scalar_lea.vmem [#allocation7], %s798_s21  ;;  %s810_s30 = sshll.u32 %s1104_s12, 9 }
  0x5a   : > { %v256_v6 = vsub.s32 0, %v1311_v3  ;;  %846 = vmatprep.subr.bf16.mxu0 %v845_v14  ;;  %861 = vmatprep.subr.bf16.mxu1 %v845_v14  ;;  %v857_v38 = vpack.c.bf16 %v227_v34, %v226_v35  ;;  %s675_s19 = sshll.u32 %s219_s16, 4  ;;  %s1607_s3 = scalar_lea.hbm %s1661_s2, %s810_s30  ;;  %s1601_s19 = int_to_ptr.vmem [resolvable:$true] %s675_s19 }
  0x5b   : > { %v243_v5 = vsub.s32 %v240_v4, %v1311_v3  ;;  %848 = vmatpush3.bf16.msra.mxu0 %v845_v14  ;;  %865 = vmatpush3.bf16.msra.mxu1 %v845_v14  ;;  %s660_s7 = scalar_lea.sflag [#allocation4], %s1294_s6  ;;  %s1026_s8 = scalar_lea.vmem %s1601_s19, 512 }
  0x5c   : > { %850 = vmatprep.subr.bf16.mxu0 %v849_v15  ;;  %862 = vmatprep.subr.bf16.mxu1 %v849_v15  ;;  %p1027_p0 = scmp.ne.s32.totalorder %s1601_s19, %s1026_s8  ;;  %p1744_p5 = scmp.ne.s32.totalorder %s1671_s22, 0 }
  0x5d   : > { %v244_v9 = vrot.slane %v799_v8, %v243_v5  ;;  %v251_v17 = vrot.slane %v237_v11, %v243_v5  ;;  %s1120_s15 = smov [#allocation7]  }
  0x5e   : > { %p1028_p7 = pnand %p1027_p0, %p1744_p5  ;;  %s1030_s18 = sshll.u32 %s1120_s15, 4  ;;  %s1031_s18 = int_to_ptr.vmem [resolvable:$false] %s1030_s18 }
  0x5f   : > { %v257_v16 = vrot.slane %v244_v9, %v256_v6  ;;  %v252_v18 = vcombine.high %v244_v9, %v244_v9  ;;  %v261_v20 = vrot.slane %v251_v17, %v256_v6  ;;  %v253_v25 = vcombine.high %v251_v17, %v251_v17  ;;  %852 = vmatpush3.bf16.msra.mxu0 %v849_v15  ;;  %s1032_s4 = scalar_lea.vmem %s1031_s18, 1024  ;;  %p1033_p10 = scmp.lt.s32.totalorder %s1601_s19, %s1031_s18 }
  0x60   : > { %866 = vmatpush3.bf16.msra.mxu1 %v849_v15  ;;  %854 = vmatprep.subr.bf16.mxu0 %v853_v29  ;;  %p1029_p13 = pneg %p1028_p7  ;;  %p1034_p12 = scmp.lt.s32.totalorder %s1032_s4, %s1026_s8 }
  0x61   : > { %v274_v19 = vmul.f32 %v257_v16, %v220_v7  ;;  %v275_v21 = vmul.f32 %v257_v16, %v221_v12  ;;  %v265_v22 = vrot.slane %v252_v18, %v256_v6  ;;  %v276_v27 = vmul.f32 %v261_v20, %v222_v10  ;;  %863 = vmatprep.subr.bf16.mxu1 %v853_v29 }
  0x62   : > { %v277_v28 = vmul.f32 %v261_v20, %v223_v13  ;;  %v269_v33 = vrot.slane %v253_v25, %v256_v6  ;;  %p1035_p1 = por %p1034_p12, %p1033_p10 }
  0x63   : > { %v283_v26 = vsel %vm1664_vm0, %v274_v19, 0.0  ;;  %v289_v30 = vsel %vm1664_vm0, %v276_v27, 0.0  ;;  %v286_v31 = vsel %vm1664_vm0, %v275_v21, 0.0  ;;  %v278_v32 = vmul.f32 %v265_v22, %v224_v24  ;;  %856 = vmatpush3.bf16.msra.mxu0 %v853_v29 }
  0x64   : > { %284 = vadd.xlane.f32.xlu0 %v283_v26  ;;  %290 = vadd.xlane.f32.xlu1 %v289_v30  ;;  %v292_v36 = vsel %vm1664_vm0, %v277_v28, 0.0  ;;  %v279_v37 = vmul.f32 %v265_v22, %v225_v23  ;;  %v280_v40 = vmul.f32 %v269_v33, %v226_v35  ;;  %v281_v42 = vmul.f32 %v269_v33, %v227_v34  ;;  %p1036_p2 = pnand %p1035_p1, %p1029_p13 }
  0x65   : > { %v295_v39 = vsel %vm1664_vm0, %v278_v32, 0.0  ;;  %867 = vmatpush3.bf16.msra.mxu1 %v853_v29  ;;  %858 = vmatprep.subr.bf16.mxu0 %v857_v38 }
  0x66   : > { %v298_v41 = vsel %vm1664_vm0, %v279_v37, 0.0  ;;  %864 = vmatprep.subr.bf16.mxu1 %v857_v38  ;;  %v301_v43 = vsel %vm1664_vm0, %v280_v40, 0.0  ;;  %v304_v44 = vsel %vm1664_vm0, %v281_v42, 0.0  ;;  %v1335_v40 = vadd.s32 8, %v1311_v3 }
  0x67   : > { %860 = vmatpush3.bf16.msra.mxu0 %v857_v38 }
  0x68   : > { %287 = vadd.xlane.f32.xlu0 %v286_v31  ;;  %293 = vadd.xlane.f32.xlu1 %v292_v36  ;;  %v1332_v36 = vand.u32 127, %v241_v0 }
  0x69   : > { %868 = vmatpush3.bf16.msra.mxu1 %v857_v38 }
  0x6a   : > { %vm390_vm1 = vcmp.eq.s32.totalorder %v1311_v3, %v1332_v36  ;;  %vm391_vm2 = vcmp.eq.s32.totalorder %v1335_v40, %v1332_v36  ;;  %vm444_vm10 = vcmp.lt.s32.totalorder %v1311_v3, %v1332_v36  ;;  %vm445_vm11 = vcmp.lt.s32.totalorder %v1335_v40, %v1332_v36 }
  0x6c   : > { %296 = vadd.xlane.f32.xlu0 %v295_v39  ;;  %299 = vadd.xlane.f32.xlu1 %v298_v41  ;;  %v1338_v41 = vadd.s32 16, %v1311_v3 }
  0x6e   : > { %vm392_vm4 = vcmp.eq.s32.totalorder %v1338_v41, %v1332_v36  ;;  %vm446_vm15 = vcmp.lt.s32.totalorder %v1338_v41, %v1332_v36 }
  0x70   : > { %302 = vadd.xlane.f32.xlu0 %v301_v43  ;;  %305 = vadd.xlane.f32.xlu1 %v304_v44  ;;  %v1341_v44 = vadd.s32 24, %v1311_v3 }
  0x72   : > { %vm393_vm5 = vcmp.eq.s32.totalorder %v1341_v44, %v1332_v36 }
  0xf1   : > { %v285_v45 = vpop.xlane.xlu0 %284  ;;  %v291_v46 = vpop.xlane.xlu1 %290 }
  0xf2   : > { %v307_v48 = vmul.f32 0.17677669, %v285_v45  ;;  %v309_v51 = vmul.f32 0.17677669, %v291_v46 }
  0xf5   : > { %v288_v47 = vpop.xlane.xlu0 %287  ;;  %v294_v50 = vpop.xlane.xlu1 %293 }
  0xf6   : > { %v308_v49 = vmul.f32 0.17677669, %v288_v47  ;;  %v310_v53 = vmul.f32 0.17677669, %v294_v50 }
  0xf8   : > { %v315_v52 = vmax.f32 %v307_v48, %v308_v49  ;;  %v322_v56 = vmax.f32 %v309_v51, %v310_v53 }
  0xf9   : > { %v297_v54 = vpop.xlane.xlu0 %296  ;;  %v300_v58 = vpop.xlane.xlu1 %299 }
  0xfa   : > { %v316_v55 = vrot.slane %v315_v52, 4  ;;  %v311_v57 = vmul.f32 0.17677669, %v297_v54  ;;  %v323_v60 = vrot.slane %v322_v56, 4  ;;  %v312_v61 = vmul.f32 0.17677669, %v300_v58 }
  0xfc   : > { %v317_v59 = vmax.f32 %v315_v52, %v316_v55  ;;  %v324_v1 = vmax.f32 %v322_v56, %v323_v60  ;;  %v329_v2 = vmax.f32 %v311_v57, %v312_v61  ;;  %v374_v60 = vadd.s32 48, %v1311_v3 }
  0xfd   : > { %v303_v62 = vpop.xlane.xlu0 %302  ;;  %v306_v5 = vpop.xlane.xlu1 %305 }
  0xfe   : > { %v318_v63 = vrot.slane %v317_v59, 2  ;;  %v313_v4 = vmul.f32 0.17677669, %v303_v62  ;;  %v325_v7 = vrot.slane %v324_v1, 2  ;;  %v330_v8 = vrot.slane %v329_v2, 4 }
  0xff   : > { %v314_v9 = vmul.f32 0.17677669, %v306_v5  ;;  %vm396_vm8 = vcmp.eq.s32.totalorder %v374_v60, %v1332_v36  ;;  %vm450_vm0 = vcmp.lt.s32.totalorder %v374_v60, %v1332_v36 }
 0x100   : > { %v319_v6 = vmax.f32 %v317_v59, %v318_v63  ;;  %v326_v11 = vmax.f32 %v324_v1, %v325_v7  ;;  %v331_v12 = vmax.f32 %v329_v2, %v330_v8 }
 0x101   : > { %v336_v13 = vmax.f32 %v313_v4, %v314_v9 }
 0x102   : > { %v320_v10 = vrot.slane %v319_v6, 1  ;;  %v327_v15 = vrot.slane %v326_v11, 1  ;;  %v332_v16 = vrot.slane %v331_v12, 2 }
 0x103   : > { %v337_v17 = vrot.slane %v336_v13, 4 }
 0x104   : > { %v321_v14 = vmax.f32 %v319_v6, %v320_v10  ;;  %v328_v20 = vmax.f32 %v326_v11, %v327_v15  ;;  %v333_v21 = vmax.f32 %v331_v12, %v332_v16 }
 0x105   : > { %v338_v22 = vmax.f32 %v336_v13, %v337_v17 }
 0x106   : > { %v343_v18 = vsub.f32 %v307_v48, %v321_v14  ;;  %v344_v19 = vsub.f32 %v308_v49, %v321_v14  ;;  %v345_v25 = vsub.f32 %v309_v51, %v328_v20  ;;  %v346_v26 = vsub.f32 %v310_v53, %v328_v20 }
 0x107   : > { %v334_v27 = vrot.slane %v333_v21, 1  ;;  %v339_v28 = vrot.slane %v338_v22, 2  ;;  %v1354_v48 = vadd.s32 32, %v1311_v3  ;;  %v1362_v51 = vadd.s32 40, %v1311_v3 }
 0x108   : > { %v351_v23 = vmul.f32 1.442695, %v343_v18  ;;  %v353_v24 = vmul.f32 1.442695, %v344_v19  ;;  %v355_v29 = vmul.f32 1.442695, %v345_v25 }
 0x109   : > { %v357_v30 = vmul.f32 1.442695, %v346_v26  ;;  %v335_v31 = vmax.f32 %v333_v21, %v334_v27  ;;  %v340_v32 = vmax.f32 %v338_v22, %v339_v28  ;;  %vm394_vm6 = vcmp.eq.s32.totalorder %v1354_v48, %v1332_v36 }
 0x10a   : > { %942 = vpow2.f32 %v351_v23  ;;  %vm395_vm7 = vcmp.eq.s32.totalorder %v1362_v51, %v1332_v36  ;;  %v1678_v25 = vmov 0  ;;  %v1680_v26 = vmov 0 }
 0x10b   : > { %944 = vpow2.f32 %v353_v24  ;;  %v347_v33 = vsub.f32 %v311_v57, %v335_v31  ;;  %v348_v34 = vsub.f32 %v312_v61, %v335_v31  ;;  %v341_v35 = vrot.slane %v340_v32, 1 }
 0x10c   : > { %946 = vpow2.f32 %v355_v29  ;;  %v375_v61 = vadd.s32 56, %v1311_v3  ;;  %v1682_v27 = vmov 0  ;;  %v1684_v28 = vmov 0 }
 0x10d   : > { %948 = vpow2.f32 %v357_v30  ;;  %v359_v37 = vmul.f32 1.442695, %v347_v33  ;;  %v361_v38 = vmul.f32 1.442695, %v348_v34  ;;  %v342_v39 = vmax.f32 %v340_v32, %v341_v35 }
 0x10e   : > { %vm397_vm9 = vcmp.eq.s32.totalorder %v375_v61, %v1332_v36  ;;  %v1686_v29 = vmov 0  ;;  %v1688_v30 = vmov 0  ;;  %v1690_v31 = vmov 0 }
 0x10f   : > { %950 = vpow2.f32 %v359_v37  ;;  %v349_v42 = vsub.f32 %v313_v4, %v342_v39  ;;  %v350_v43 = vsub.f32 %v314_v9, %v342_v39  ;;  %v1692_v32 = vmov 0 }
 0x110   : > { %952 = vpow2.f32 %v361_v38  ;;  %v1694_v33 = vmov 0  ;;  %v1699_v35 = vmov 0  ;;  %v1705_v38 = vmov 0 }
 0x111   : > { %v363_v0 = vmul.f32 1.442695, %v349_v42  ;;  %v365_v45 = vmul.f32 1.442695, %v350_v43 }
 0x113   : > { %954 = vpow2.f32 %v363_v0 }
 0x114   : > { %v1347_v46 = vpop.eup %942  ;;  %956 = vpow2.f32 %v365_v45 }
 0x115   : > { %v1351_v47 = vpop.eup %944  ;;  %v398_v49 = vsel %vm390_vm1, %v1347_v46, 0.0 }
 0x116   : > { %v1359_v50 = vpop.eup %946  ;;  %v399_v52 = vsel %vm391_vm2, %v1351_v47, 0.0  ;;  %v407_v53 = vsel %vm1665_vm3, %v398_v49, 0.0  ;;  %vm447_vm2 = vcmp.lt.s32.totalorder %v1341_v44, %v1332_v36  ;;  %v1119_v44 = vmov 0  }
 0x117   : > { %v1366_v54 = vpop.eup %948  ;;  %v400_v55 = vsel %vm392_vm4, %v1359_v50, 0.0  ;;  %v408_v56 = vsel %vm1665_vm3, %v399_v52, 0.0 }
 0x118   : > { %v401_v57 = vsel %vm393_vm5, %v1366_v54, 0.0  ;;  %v409_v58 = vadd.f32 %v408_v56, %v407_v53  ;;  %v410_v59 = vsel %vm1665_vm3, %v400_v55, 0.0 }
 0x119   : > { %v1378_v63 = vpop.eup %950  ;;  %v412_v1 = vsel %vm1665_vm3, %v401_v57, 0.0 }
 0x11a   : > { %v411_v62 = vadd.f32 %v410_v59, %v409_v58  ;;  %v1381_v2 = vpop.eup %952  ;;  %v402_v4 = vsel %vm394_vm6, %v1378_v63, 0.0  ;;  %vm448_vm6 = vcmp.lt.s32.totalorder %v1354_v48, %v1332_v36 }
 0x11b   : > { %v403_v6 = vsel %vm395_vm7, %v1381_v2, 0.0  ;;  %v414_v7 = vsel %vm1665_vm3, %v402_v4, 0.0 }
 0x11c   : > { %v413_v5 = vadd.f32 %v412_v1, %v411_v62  ;;  %v416_v10 = vsel %vm1665_vm3, %v403_v6, 0.0 }
 0x11d   : > { %v1388_v9 = vpop.eup %954 }
 0x11e   : > { %v415_v8 = vadd.f32 %v414_v7, %v413_v5  ;;  %v1391_v11 = vpop.eup %956  ;;  %v404_v12 = vsel %vm396_vm8, %v1388_v9, 0.0 }
 0x11f   : > { %v405_v14 = vsel %vm397_vm9, %v1391_v11, 0.0  ;;  %v418_v15 = vsel %vm1665_vm3, %v404_v12, 0.0  ;;  %vm449_vm9 = vcmp.lt.s32.totalorder %v1362_v51, %v1332_v36 }
 0x120   : > { %v417_v13 = vadd.f32 %v416_v10, %v415_v8  ;;  %v420_v17 = vsel %vm1665_vm3, %v405_v14, 0.0 }
 0x122   : > { %v419_v16 = vadd.f32 %v418_v15, %v417_v13 }
 0x124   : > { %v421_v18 = vadd.f32 %v420_v17, %v419_v16 }
 0x126   : > { %v422_v19 = vrot.slane %v421_v18, 4 }
 0x128   : > { %v423_v20 = vadd.f32 %v422_v19, %v421_v18 }
 0x12a   : > { %v424_v21 = vrot.slane %v423_v20, 2 }
 0x12c   : > { %v425_v22 = vadd.f32 %v424_v21, %v423_v20 }
 0x12e   : > { %v426_v23 = vrot.slane %v425_v22, 1 }
 0x130   : > { %v1397_v24 = vadd.f32 %v426_v23, %v425_v22 }
 0x132   : > { %vm436_vm12 = vcmp.eq.f32.partialorder %v1347_v46, %v1397_v24  ;;  %vm437_vm13 = vcmp.eq.f32.partialorder %v1351_v47, %v1397_v24  ;;  %vm438_vm14 = vcmp.eq.f32.partialorder %v1359_v50, %v1397_v24  ;;  %vm439_vm1 = vcmp.eq.f32.partialorder %v1366_v54, %v1397_v24 }
 0x133   : > { %vm1415_vm4 = vmand %vm436_vm12, %vm444_vm10  ;;  %vm440_vm5 = vcmp.eq.f32.partialorder %v1378_v63, %v1397_v24  ;;  %vm441_vm8 = vcmp.eq.f32.partialorder %v1381_v2, %v1397_v24  ;;  %vm442_vm12 = vcmp.eq.f32.partialorder %v1388_v9, %v1397_v24 }
 0x134   : > { %v1679_v25 = vsel %vm1415_vm4, 4294967295, %v1678_v25  ;;  %vm1423_vm7 = vmand %vm437_vm13, %vm445_vm11  ;;  %vm379_vm11 = vcmp.ge.s32.totalorder %v1332_v36, 16  ;;  %vm383_vm13 = vcmp.lt.s32.totalorder %v1332_v36, 32  ;;  %vm429_vm4 = vcmp.gt.f32.partialorder %v1351_v47, %v1397_v24 }
 0x135   : > { %v1681_v26 = vsel %vm1423_vm7, 4294967295, %v1680_v26  ;;  %vm1431_vm10 = vmand %vm438_vm14, %vm446_vm15  ;;  %vm443_vm7 = vcmp.eq.f32.partialorder %v1391_v11, %v1397_v24  ;;  %vm451_vm14 = vcmp.lt.s32.totalorder %v375_v61, %v1332_v36 }
 0x136   : > { %v1683_v27 = vsel %vm1431_vm10, 4294967295, %v1682_v27  ;;  %vm1438_vm3 = vmand %vm439_vm1, %vm447_vm2  ;;  %vm428_vm10 = vcmp.gt.f32.partialorder %v1347_v46, %v1397_v24  ;;  %vm380_vm2 = vcmp.ge.s32.totalorder %v1332_v36, 32 }
 0x137   : > { %v1685_v28 = vsel %vm1438_vm3, 4294967295, %v1684_v28  ;;  %vm1447_vm15 = vmand %vm440_vm5, %vm448_vm6  ;;  %vm384_vm3 = vcmp.lt.s32.totalorder %v1332_v36, 48 }
 0x138   : > { %v1687_v29 = vsel %vm1447_vm15, 4294967295, %v1686_v29  ;;  %vm1453_vm1 = vmand %vm441_vm8, %vm449_vm9  ;;  %vm430_vm8 = vcmp.gt.f32.partialorder %v1359_v50, %v1397_v24  ;;  %vm385_vm15 = vcmp.lt.s32.totalorder %v1332_v36, 64 }
 0x139   : > { %v1689_v30 = vsel %vm1453_vm1, 4294967295, %v1688_v30  ;;  %vm1461_vm5 = vmand %vm442_vm12, %vm450_vm0  ;;  %vm381_vm1 = vcmp.ge.s32.totalorder %v1332_v36, 48  ;;  %vm431_vm0 = vcmp.gt.f32.partialorder %v1366_v54, %v1397_v24  ;;  %vm1696_vm12 = vnez %v1679_v25 }
 0x13a   : > { %v1691_v31 = vsel %vm1461_vm5, 4294967295, %v1690_v31  ;;  %vm1465_vm6 = vmand %vm379_vm11, %vm383_vm13  ;;  %vm1702_vm5 = vnez %v1683_v27 }
 0x13b   : > { %v1693_v32 = vsel %vm1465_vm6, 4294967295, %v1692_v32  ;;  %vm1471_vm9 = vmand %vm443_vm7, %vm451_vm14  ;;  %vm432_vm7 = vcmp.gt.f32.partialorder %v1378_v63, %v1397_v24  ;;  %vm1701_vm14 = vnez %v1681_v26 }
 0x13c   : > { %v1695_v33 = vsel %vm1471_vm9, 4294967295, %v1694_v33  ;;  %vm1481_vm11 = vmor %vm428_vm10, %vm1696_vm12  ;;  %vm433_vm9 = vcmp.gt.f32.partialorder %v1381_v2, %v1397_v24 }
 0x13d   : > { %vm1485_vm13 = vmand %vm380_vm2, %vm384_vm3  ;;  %vm434_vm3 = vcmp.gt.f32.partialorder %v1388_v9, %v1397_v24  ;;  %vm1707_vm2 = vnez %v1685_v28 }
 0x13e   : > { %v1700_v35 = vsel %vm1485_vm13, 4294967295, %v1699_v35  ;;  %vm461_vm6 = vmor %vm429_vm4, %vm1701_vm14  ;;  %vm435_vm4 = vcmp.gt.f32.partialorder %v1391_v11, %v1397_v24 }
 0x13f   : > { %vm1497_vm10 = vmor %vm430_vm8, %vm1702_vm5  ;;  %vm1710_vm5 = vnez %v1687_v29 }
 0x140   : > { %vm1501_vm12 = vmand %vm381_vm1, %vm385_vm15  ;;  %vm382_vm15 = vcmp.lt.s32.totalorder %v1332_v36, 16  ;;  %vm1713_vm1 = vnez %v1689_v30 }
 0x141   : > { %v1706_v38 = vsel %vm1501_vm12, 4294967295, %v1705_v38  ;;  %vm1509_vm13 = vmor %vm431_vm0, %vm1707_vm2  ;;  %vm1716_vm0 = vnez %v1691_v31  ;;  %vm1719_vm12 = vnez %v1695_v33 }
 0x142   : > { %vm1517_vm8 = vmor %vm432_vm7, %vm1710_vm5 }
 0x143   : > { %vm1524_vm14 = vmor %vm433_vm9, %vm1713_vm1 }
 0x144   : > { %vm1530_vm2 = vmor %vm434_vm3, %vm1716_vm0  ;;  %vm1722_vm3 = vnez %v1693_v32 }
 0x145   : > { %vm1536_vm7 = vmor %vm435_vm4, %vm1719_vm12 }
 0x146   : > { %vm468_vm9 = vmand %vm382_vm15, %vm1481_vm11  ;;  %vm1723_vm11 = vnez %v1700_v35 }
 0x147   : > { %vm469_vm5 = vmand %vm382_vm15, %vm461_vm6  ;;  %v476_v0 = vsel %vm468_vm9, 1, %v1119_v44  ;;  %vm1724_vm6 = vcmask 523264  }
 0x148   : > { %vm470_vm1 = vmand %vm1722_vm3, %vm1497_vm10  ;;  %v477_v45 = vsel %vm469_vm5, 1, %v1119_v44  ;;  %v484_v48 = vsel %vm1724_vm6, %v476_v0, 0 }
 0x149   : > { %vm471_vm12 = vmand %vm1722_vm3, %vm1509_vm13  ;;  %v478_v46 = vsel %vm470_vm1, 1, %v1119_v44  ;;  %vm1726_vm13 = vnez %v1706_v38 }
 0x14a   : > { %vm472_vm4 = vmand %vm1723_vm11, %vm1517_vm8  ;;  %v479_v47 = vsel %vm471_vm12, 1, %v1119_v44 }
 0x14b   : > { %vm473_vm10 = vmand %vm1723_vm11, %vm1524_vm14  ;;  %v480_v49 = vsel %vm472_vm4, 1, %v1119_v44 }
 0x14c   : > { %vm1725_vm0 = vmmov %vm1724_vm6  ;;  %v481_v51 = vsel %vm473_vm10, 1, %v1119_v44 }
 0x14d   : > { %v485_v50 = vsel %vm1725_vm0, %v477_v45, 0  ;;  %vm474_vm9 = vmand %vm1726_vm13, %vm1530_vm2 }
 0x14e   : > { %vm1727_vm5 = vmmov %vm1725_vm0  ;;  %v482_v54 = vsel %vm474_vm9, 1, %v1119_v44 }
 0x14f   : > { %v486_v52 = vsel %vm1727_vm5, %v478_v46, 0  ;;  %vm1728_vm8 = vmmov %vm1725_vm0 }
 0x150   : > { %v488_v53 = vsel %vm1728_vm8, %v480_v49, 0  ;;  %vm475_vm1 = vmand %vm1726_vm13, %vm1536_vm7 }
 0x151   : > { %vm1729_vm14 = vmmov %vm1725_vm0  ;;  %v489_v56 = vadd.s32 %v488_v53, %v484_v48  ;;  %v483_v58 = vsel %vm475_vm1, 1, %v1119_v44 }
 0x152   : > { %v487_v55 = vsel %vm1729_vm14, %v479_v47, 0  ;;  %vm1730_vm12 = vmmov %vm1725_vm0 }
 0x153   : > { %v490_v57 = vsel %vm1730_vm12, %v481_v51, 0  ;;  %vm1731_vm4 = vmmov %vm1725_vm0 }
 0x154   : > { %v491_v59 = vadd.s32 %v490_v57, %v485_v50  ;;  %v492_v60 = vsel %vm1731_vm4, %v482_v54, 0  ;;  %vm1732_vm2 = vmmov %vm1725_vm0 }
 0x155   : > { %v493_v61 = vadd.s32 %v492_v60, %v486_v52  ;;  %v494_v62 = vsel %vm1732_vm2, %v483_v58, 0  ;;  %vm1733_vm5 = vmmov %vm1725_vm0 }
 0x156   : > { %v495_v63 = vadd.s32 %v494_v62, %v487_v55  ;;  %v496_v1 = vadd.s32 %v491_v59, %v489_v56  ;;  %vm1734_vm8 = vmmov %vm1725_vm0 }
 0x157   : > { %vm1735_vm1 = vmmov %vm1725_vm0 }
 0x158   : > { %v497_v2 = vadd.s32 %v495_v63, %v493_v61  ;;  %vm1737_vm14 = vmmov %vm1725_vm0 }
 0x159   : > { %vm1739_vm12 = vmmov %vm1725_vm0 }
 0x15a   : > { %v498_v4 = vadd.s32 %v497_v2, %v496_v1 }
 0x15c   : > { %v499_v5 = vrot.slane %v498_v4, 4 }
 0x15e   : > { %v500_v6 = vadd.s32 %v499_v5, %v498_v4 }
 0x160   : > { %v501_v7 = vrot.slane %v500_v6, 2 }
 0x162   : > { %v502_v8 = vadd.s32 %v501_v7, %v500_v6 }
 0x164   : > { %v503_v9 = vrot.slane %v502_v8, 1 }
 0x166   : > { %v504_v10 = vadd.s32 %v503_v9, %v502_v8 }
 0x168   : > { %vm505_vm7 = vcmp.eq.s32.totalorder %v504_v10, %v1311_v3 }
 0x169   : > { %vm506_vm6 = vmand %vm382_vm15, %vm505_vm7 }
 0x16a   : > { %v510_v11 = vsel %vm506_vm6, %v1397_v24, 0.0  ;;  %vm508_vm10 = vmand %vm1723_vm11, %vm505_vm7 }
 0x16b   : > { %839 = vmatprep.mubr.msk.f32.mxu0 %vm1725_vm0, %v510_v11  ;;  %v512_v12 = vsel %vm508_vm10, %v1397_v24, 0.0  ;;  %vm509_vm9 = vmand %vm1726_vm13, %vm505_vm7  ;;  %v611_v13 = vsel %vm1733_vm5, %v510_v11, 0.0 }
 0x16c   : > { %842 = vmatprep.mubr.msk.f32.mxu1 %vm1734_vm8, %v512_v12  ;;  %v513_v3 = vsel %vm509_vm9, %v1397_v24, 0.0  ;;  %vm507_vm15 = vmand %vm1722_vm3, %vm505_vm7  ;;  %612 = vadd.xlane.f32.xlu0 %v611_v13  ;;  %vm1740_vm3 = vcmask 261120  }
 0x16d   : > { %843 = vmatmul.mubr.msk.f32.vlgmr.msra.gmra.mrb[0].mxu1 %vm1735_vm1, %v513_v3  ;;  %v511_v36 = vsel %vm507_vm15, %v1397_v24, 0.0  ;;  %vm1736_vm11 = vmmov %vm1725_vm0  ;;  %v620_v16 = vsel %vm1739_vm12, %v513_v3, 0.0 }
 0x16e   : > { %v614_v14 = vsel %vm1736_vm11, %v511_v36, 0.0  ;;  %840 = vmatmul.mubr.msk.f32.vlgmr.msra.gmra.mrb[0].mxu0 %vm1737_vm14, %v511_v36  ;;  %vm1738_vm13 = vmmov %vm1725_vm0 }
 0x16f   : > { %615 = vadd.xlane.f32.xlu1 %v614_v14  ;;  %v617_v15 = vsel %vm1738_vm13, %v512_v12, 0.0  ;;  %vm1741_vm4 = vmmov %vm1740_vm3 }
 0x170   : > { %618 = vadd.xlane.f32.xlu0 %v617_v15  ;;  %vm1742_vm2 = vmmov %vm1740_vm3 }
 0x171   : > { %vm1743_vm7 = vmmov %vm1742_vm2 }
 0x173   : > { %621 = vadd.xlane.f32.xlu1 %v620_v16 }
 0x1f9   : > { %v613_v18 = vpop.xlane.xlu0 %612 }
 0x1fa   : > { %v623_v25 = vrot.slane %v613_v18, 4 }
 0x1fc   : > { %v616_v17 = vpop.xlane.xlu1 %615  ;;  %v624_v28 = vadd.f32 %v623_v25, %v613_v18 }
 0x1fd   : > { %v619_v20 = vpop.xlane.xlu0 %618  ;;  %v629_v21 = vrot.slane %v616_v17, 4 }
 0x1fe   : > { %v635_v23 = vrot.slane %v619_v20, 4  ;;  %v625_v32 = vrot.slane %v624_v28, 2 }
 0x1ff   : > { %v630_v24 = vadd.f32 %v629_v21, %v616_v17 }
 0x200   : > { %v622_v19 = vpop.xlane.xlu1 %621  ;;  %v636_v27 = vadd.f32 %v635_v23, %v619_v20  ;;  %v626_v37 = vadd.f32 %v625_v32, %v624_v28 }
 0x201   : > { %v641_v22 = vrot.slane %v622_v19, 4  ;;  %v631_v29 = vrot.slane %v630_v24, 2 }
 0x202   : > { %v637_v31 = vrot.slane %v636_v27, 2  ;;  %v627_v41 = vrot.slane %v626_v37, 1 }
 0x203   : > { %v642_v26 = vadd.f32 %v641_v22, %v622_v19  ;;  %v632_v33 = vadd.f32 %v631_v29, %v630_v24 }
 0x204   : > { %v638_v35 = vadd.f32 %v637_v31, %v636_v27  ;;  %v628_v0 = vadd.f32 %v627_v41, %v626_v37 }
 0x205   : > { %v643_v30 = vrot.slane %v642_v26, 2  ;;  %v633_v38 = vrot.slane %v632_v33, 1 }
 0x206   : > { %v639_v40 = vrot.slane %v638_v35, 1 }
 0x207   : > { %v644_v34 = vadd.f32 %v643_v30, %v642_v26  ;;  %v634_v42 = vadd.f32 %v633_v38, %v632_v33 }
 0x208   : > { %v640_v44 = vadd.f32 %v639_v40, %v638_v35 }
 0x209   : > { %v645_v39 = vrot.slane %v644_v34, 1  ;;  %958 = vrcp.f32 %v634_v42 }
 0x20b   : > { %v646_v43 = vadd.f32 %v645_v39, %v644_v34 }
 0x20d   : > { %960 = vrcp.f32 %v646_v43 }
 0x20e   : > { %962 = vrcp.f32 %v640_v44 }
 0x20f   : > { %964 = vrcp.f32 %v628_v0 }
 0x213   : > { %v959_v45 = vpop.eup %958 }
 0x217   : > { %v961_v46 = vpop.eup %960 }
 0x218   : > { %v963_v48 = vpop.eup %962 }
 0x219   : > { %v965_v52 = vpop.eup %964 }
 0x240   : > { %v844_v47 = vpop.f32.mrb[0].mxu1 }
 0x241   : > { %v841_v49 = vpop.f32.mrb[0].mxu0  ;;  %v654_v50 = vmul.f32 %v961_v46, %v844_v47  ;;  %v602_v51 = vpop.f32.mrb[1].mxu1 }
 0x242   : > { %v652_v53 = vmul.f32 %v959_v45, %v841_v49  ;;  %v592_v54 = vpop.f32.mrb[1].mxu0  ;;  %v653_v55 = vmul.f32 %v963_v48, %v602_v51 }
 0x243   : > { %658 = vst.msk [vmem:[%s219_s16 + $0x18] sm:$0xff] %vm1740_vm3, %v654_v50  ;;  %v651_v56 = vmul.f32 %v965_v52, %v592_v54 }
 0x244   : > { %656 = vst.msk [vmem:[%s219_s16 + $0x8] sm:$0xff] %vm1741_vm4, %v652_v53 }
 0x245   : > { %657 = vst.msk [vmem:[%s219_s16 + $0x10] sm:$0xff] %vm1742_vm2, %v653_v55 }
 0x246   : > { %655 = vst.msk [vmem:[%s219_s16] sm:$0xff] %vm1743_vm7, %v651_v56 }
 0x247   : > { %1039 = shalt.err (!%p1036_p2)
}
 0x248   : > { %s1040_s20 = scalar_lea.hbm %s1607_s3, 512  ;;  %s1044_s25 = scalar_lea.hbm %s1661_s2, 1024 }
 0x249   : > { %p1041_p9 = scmp.ne.s32.totalorder %s1607_s3, %s1040_s20  ;;  %p1045_p6 = scmp.lt.u32.totalorder %s1607_s3, %s1661_s2 }
 0x24a   : > { %p1046_p4 = scmp.lt.u32.totalorder %s1044_s25, %s1040_s20  ;;  %p1048_p0 = scmp.lt.u32.totalorder %s1040_s20, %s1607_s3 }
 0x24b   : > { %p1042_p11 = pnand %p1041_p9, %p1744_p5 }
 0x24c   : > { %p1047_p8 = por %p1046_p4, %p1045_p6 }
 0x24d   : > { %p1043_p3 = pneg %p1042_p11 }
 0x24e   : > { %p1049_p7 = por %p1048_p0, %p1047_p8 }
 0x250   : > { %p1050_p13 = pnand %p1049_p7, %p1043_p3 }
 0x252   : > { %1053 = shalt.err (!%p1050_p13)
}
 0x253   : > { %s1121_s21 = smov 128   ;;  %s1122_s16 = smov 8  }
 0x254   : > { %873 = dma.vmem_to_hbm [thread:$0]  (%p1744_p5), %s1601_s19, 512, %s1607_s3, %s660_s7, %s1121_s21, %s1121_s21, %s1122_s16  }
 0x255 PF: > { %s690_s30 = sand.u32 1, %s1092_s9   ;;  %p1745_p10 = scmp.ne.s32.totalorder %s1672_s24, 0 }
 0x256   : > { %p1746_p12 = scmp.ge.s32.totalorder %s1112_s14, 2  ;;  %s691_s28 = scalar_lea.sflag [#allocation4], %s690_s30 }
 0x258   : > { %p883_p1 = pnand %p1746_p12, %p1745_p10 }
 0x25a   : > { %1087 = dma.done.wait (!%p883_p1), %s691_s28, 512  }
 0x25b   : > { %1089 = vsyncadd (!%p883_p1), %s691_s28, 4294966784  ;;  %s21_s14 = sadd.s32 1, %s1112_s14   ;;  %s1747_s9 = smov %s1096_s10 }
 0x25c   : > { %p18_p2 = scmp.ge.s32.totalorder %s21_s14, 4   ;;  %s1748_s10 = smov %s1100_s11 }
 0x25d   : > { %s1749_s11 = smov %s1194_s23  ;;  %s1750_s12 = smov %s1108_s13 }
 0x25e   : > { %s1751_s13 = smov %s1753_s17  ;;  %20 = sbr.rel (!%p18_p2) target bundleno = 8 (0x8), region = 86 }
 0x265   :  { %696 = vsyncpa [#allocation3], 1 }
 0x266   :  { %698 = vsyncpa [#allocation3 + $0x1], 1 }
 0x267   :  { %699 = vsyncpa [#allocation6], 1 }
 0x268   :  { %701 = vsyncpa [#allocation6 + $0x1], 1 }
 0x269   :  { %702 = vsyncpa [#allocation4], 1 }
 0x26a   :  { %704 = vsyncpa [#allocation4 + $0x1], 1 }

</bundles_post_ra>
